<compile_context>
chip_gen: v5e
topology: v5e:2x2
jax: 0.10.0
libtpu: 0.0.40
codegen_flags: <defaults>
</compile_context>

<pallas_src>
import jax
import jax.numpy as jnp
from jax.experimental import pallas as pl
from jax.experimental.pallas import tpu as pltpu

LANE = 128
BF16_SUBLANE = 16   # bf16 packs 16 sublanes per vreg


def _round_up(x, m):
    return ((x + m - 1) // m) * m


# ----------------------------- Pallas kernel ------------------------------- #
def gcn2_kernel(a_ref, x_ref, w1_ref, b1_ref, w2_ref, b2_ref, o_ref):
    """Fused 2-layer GCN forward for NG graphs of the batch (one grid step).

    a_ref : (1, M, M)    f32   block-diagonal normalized adjacency, M = NG*Np
    x_ref : (NG, Np, Fp) bf16  node features (zero-padded)
    w1_ref: (Fp, Hp)     bf16  b1_ref: (1, Hp) f32
    w2_ref: (Hp, Hp)     bf16  b2_ref: (1, Hp) f32
    o_ref : (NG, Np, Hp) f32
    """
    ng, np_, hp = o_ref.shape
    fp = x_ref.shape[-1]
    m = ng * np_

    a = a_ref[0]                                    # (M, M) f32 block-diag
    xs = x_ref[...].reshape(m, fp)                  # fold batch into MXU M dim

    # Layer 1: A_hat @ (X @ W1) + b1, ReLU.  bf16 MXU inputs, f32 accumulate.
    xw1 = jnp.dot(xs, w1_ref[...], preferred_element_type=jnp.float32)
    h1 = jnp.dot(a, xw1, preferred_element_type=jnp.float32)
    h1 = jnp.maximum(h1 + b1_ref[...], 0.0)

    # Layer 2: A_hat @ (H1 @ W2) + b2.
    hw2 = jnp.dot(h1.astype(jnp.bfloat16), w2_ref[...],
                  preferred_element_type=jnp.float32)
    out = jnp.dot(a, hw2, preferred_element_type=jnp.float32) + b2_ref[...]

    # Lane-dense (Hp multiple of 128) f32 store; reshape is sublane-aligned
    # (Np is a multiple of 16 rows).
    o_ref[...] = out.reshape(ng, np_, hp).astype(o_ref.dtype)


# ----------------------------- wrapper -------------------------------------- #
@jax.jit
def view_encoder_forward(a_hat, x, w1, b1, w2, b2):
    """Batched forward.

    a_hat: (B, N, N) f32, x: (B, N, Fin) f32,
    w1: (Fin, H), b1: (H,), w2: (H, H), b2: (H,).
    Returns (B, N, H) f32.
    """
    bsz, n, fin = x.shape
    h = w1.shape[1]

    np_ = _round_up(n, BF16_SUBLANE)   # bf16 sublane packing -> multiple of 16
    fp = _round_up(fin, LANE)          # lane-dense feature dim
    hp = _round_up(h, LANE)            # lane-dense hidden dim (>=128)

    # >=2 parallel steps when possible so both v7x TensorCores get work;
    # each step processes ng graphs stacked into one set of matmuls.
    n_steps = 2 if (bsz >= 2 and bsz % 2 == 0) else 1
    ng = bsz // n_steps
    m = ng * np_

    # Fused pad (+ cast) instead of zeros().at[].set() scatter updates.
    x_p = jnp.pad(x, ((0, 0), (0, np_ - n), (0, fp - fin))).astype(jnp.bfloat16)
    a_p = jnp.pad(a_hat, ((0, 0), (0, np_ - n), (0, np_ - n)))   # stays f32
    w1_p = jnp.pad(w1, ((0, fp - fin), (0, hp - h))).astype(jnp.bfloat16)
    w2_p = jnp.pad(w2, ((0, hp - h), (0, hp - h))).astype(jnp.bfloat16)
    b1_p = jnp.pad(b1.astype(jnp.float32).reshape(1, -1), ((0, 0), (0, hp - h)))
    b2_p = jnp.pad(b2.astype(jnp.float32).reshape(1, -1), ((0, 0), (0, hp - h)))

    # Per-step block-diagonal adjacency (n_steps, M, M): a single A matmul per
    # layer per step and an M-lane-wide (instead of Np-wide) A block.
    a4 = a_p.reshape(n_steps, ng, np_, np_)
    eye_ng = jnp.eye(ng, dtype=a_p.dtype)
    a_bd = (a4[:, :, :, None, :] * eye_ng[None, :, None, :, None]
            ).reshape(n_steps, m, m)

    # VMEM scaling guard (v7x: 64 MiB physical, 32 MiB scoped default).  For
    # large N, tile the A_hat matmuls over node blocks and/or raise
    # vmem_limit_bytes via pltpu.CompilerParams instead of one big block.
    vmem_est = 2 * (m * m * 4 + ng * np_ * fp * 2 + ng * np_ * hp * 4
                    + fp * hp * 2 + hp * hp * 2 + 2 * hp * 4)
    assert vmem_est < 24 * 1024 * 1024, (
        "Per-step blocks would exceed VMEM headroom; tile the node dimension.")

    # Same block every step -> fetched once, stays VMEM-resident.
    resident = lambda shape: pl.BlockSpec(shape, lambda i: (0,) * len(shape))

    out_p = pl.pallas_call(
        gcn2_kernel,
        out_shape=jax.ShapeDtypeStruct((bsz, np_, hp), jnp.float32),
        grid_spec=pltpu.PrefetchScalarGridSpec(
            num_scalar_prefetch=0,
            grid=(n_steps,),
            in_specs=[
                pl.BlockSpec((1, m, m), lambda i: (i, 0, 0)),      # block-diag A
                pl.BlockSpec((ng, np_, fp), lambda i: (i, 0, 0)),  # X (bf16)
                resident((fp, hp)),                                # W1
                resident((1, hp)),                                 # b1
                resident((hp, hp)),                                # W2
                resident((1, hp)),                                 # b2
            ],
            out_specs=pl.BlockSpec((ng, np_, hp), lambda i: (i, 0, 0)),
        ),
        compiler_params=pltpu.CompilerParams(
            dimension_semantics=("parallel",),
        ),
    )(a_bd, x_p, w1_p, b1_p, w2_p, b2_p)

    # Padded rows [n:np_] hold bias-propagated values (not zeros); strip them
    # here so no consumer ever sees them.
    return out_p[:, :n, :h]


# ----------------------------- JAX glue ------------------------------------ #
def build_normalized_adjacency(edge_index, edge_weight, num_nodes):
    """Dense D^{-1/2} (A + I) D^{-1/2} matching PyG gcn_norm semantics.

    edge_index[0] = source nodes, edge_index[1] = destination nodes;
    messages flow source -> destination, so A[dst, src] = edge_weight.
    """
    src = edge_index[0]
    dst = edge_index[1]
    a = jnp.zeros((num_nodes, num_nodes), jnp.float32)
    a = a.at[dst, src].add(edge_weight.astype(jnp.float32))
    a = a + jnp.eye(num_nodes, dtype=jnp.float32)   # self-loops, weight 1
    deg = a.sum(axis=1)
    dinv = jnp.where(deg > 0, 1.0 / jnp.sqrt(deg), 0.0)
    return dinv[:, None] * a * dinv[None, :]


def init_view_encoder_params(key, input_dim, hidden_dim):
    """Deterministic glorot-uniform weights (PyG default) and zero biases."""
    k1, k2 = jax.random.split(key)

    def glorot(k, fan_in, fan_out):
        lim = jnp.sqrt(6.0 / (fan_in + fan_out))
        return jax.random.uniform(
            k, (fan_in, fan_out), jnp.float32, minval=-lim, maxval=lim)

    w1 = glorot(k1, input_dim, hidden_dim)
    b1 = jnp.zeros((hidden_dim,), jnp.float32)
    w2 = glorot(k2, hidden_dim, hidden_dim)
    b2 = jnp.zeros((hidden_dim,), jnp.float32)
    return w1, b1, w2, b2


def view_encoder_reference(a_hat, x, w1, b1, w2, b2):
    """Pure-JAX f32 reference (per graph) for correctness checking."""
    h1 = jnp.maximum(a_hat @ (x @ w1) + b1[None, :], 0.0)
    return a_hat @ (h1 @ w2) + b2[None, :]


# ----------------------------- main ----------------------------------------- #
if __name__ == "__main__":
    num_graphs = 4
    num_nodes = 16
    input_dim = 8
    hidden_dim = 32
    num_edges = 40

    key = jax.random.PRNGKey(0)
    k_x, k_src, k_dst, k_ew, k_params = jax.random.split(key, 5)

    # Batched node features and random weighted directed graphs (no self loops).
    x = jax.random.normal(k_x, (num_graphs, num_nodes, input_dim), jnp.float32)
    src = jax.random.randint(k_src, (num_graphs, num_edges), 0, num_nodes)
    dst_raw = jax.random.randint(k_dst, (num_graphs, num_edges), 0, num_nodes)
    dst = jnp.where(dst_raw == src, (dst_raw + 1) % num_nodes, dst_raw)
    edge_index = jnp.stack([src, dst], axis=1)  # (B, 2, E)
    edge_weight = jax.random.uniform(
        k_ew, (num_graphs, num_edges), jnp.float32, minval=0.1, maxval=1.0)

    w1, b1, w2, b2 = init_view_encoder_params(k_params, input_dim, hidden_dim)

    a_hat = jax.vmap(build_normalized_adjacency, in_axes=(0, 0, None))(
        edge_index, edge_weight, num_nodes)  # (B, N, N)

    out = view_encoder_forward(a_hat, x, w1, b1, w2, b2)
    out = jax.block_until_ready(out)

    ref = jax.vmap(view_encoder_reference,
                   in_axes=(0, 0, None, None, None, None))(
        a_hat, x, w1, b1, w2, b2)
    assert out.shape == (num_graphs, num_nodes, hidden_dim)
    # bf16 MXU inputs (X, W1, W2) with f32 accumulation; A_hat kept f32.
    assert jnp.allclose(out, ref, atol=5e-2, rtol=5e-2)

    print("KERNEL_OK")
</pallas_src>

<mosaic_0001>
module attributes {stable_mosaic.version = 11 : i64} {
  func.func @gcn2_kernel(%arg0: i32, %arg1: memref<1x32x32xf32, #tpu.memory_space<vmem>>, %arg2: memref<2x16x128xbf16, #tpu.memory_space<vmem>>, %arg3: memref<128x128xbf16, #tpu.memory_space<vmem>>, %arg4: memref<1x128xf32, #tpu.memory_space<vmem>>, %arg5: memref<128x128xbf16, #tpu.memory_space<vmem>>, %arg6: memref<1x128xf32, #tpu.memory_space<vmem>>, %arg7: memref<2x16x128xf32, #tpu.memory_space<vmem>>) attributes {dimension_semantics = [#tpu.dimension_semantics<parallel>], iteration_bounds = array<i64: 2>, scalar_prefetch = 0 : i64, scratch_operands = 0 : i64, tpu.core_type = #tpu.core_type<tc>, window_params = [{transform_indices = @transform_0, window_bounds = array<i64: 1, 32, 32>}, {transform_indices = @transform_1, window_bounds = array<i64: 2, 16, 128>}, {pipeline_mode = #tpu.pipeline_mode<synchronous>, transform_indices = @transform_2, window_bounds = array<i64: 128, 128>}, {pipeline_mode = #tpu.pipeline_mode<synchronous>, transform_indices = @transform_3, window_bounds = array<i64: 1, 128>}, {pipeline_mode = #tpu.pipeline_mode<synchronous>, transform_indices = @transform_4, window_bounds = array<i64: 128, 128>}, {pipeline_mode = #tpu.pipeline_mode<synchronous>, transform_indices = @transform_5, window_bounds = array<i64: 1, 128>}, {transform_indices = @transform_6, window_bounds = array<i64: 2, 16, 128>}]} {
    %c0 = arith.constant 0 : index
    %c0_0 = arith.constant 0 : index
    %c0_1 = arith.constant 0 : index
    %0 = vector.load %arg1[%c0, %c0_0, %c0_1] : memref<1x32x32xf32, #tpu.memory_space<vmem>>, vector<1x32x32xf32>
    %1 = vector.shape_cast %0 : vector<1x32x32xf32> to vector<32x32xf32>
    %c0_2 = arith.constant 0 : index
    %c0_3 = arith.constant 0 : index
    %c0_4 = arith.constant 0 : index
    %2 = vector.load %arg2[%c0_2, %c0_3, %c0_4] : memref<2x16x128xbf16, #tpu.memory_space<vmem>>, vector<2x16x128xbf16>
    %3 = vector.shape_cast %2 : vector<2x16x128xbf16> to vector<32x128xbf16>
    %c0_5 = arith.constant 0 : index
    %c0_6 = arith.constant 0 : index
    %4 = vector.load %arg3[%c0_5, %c0_6] : memref<128x128xbf16, #tpu.memory_space<vmem>>, vector<128x128xbf16>
    %cst = arith.constant dense<0.000000e+00> : vector<32x128xf32>
    %5 = tpu.matmul %3, %4, %cst {dimension_numbers = #tpu.dot_dimension_numbers<[1], [0], [0], [1], [0, 0, 1, 1], [], []>} : vector<32x128xbf16>, vector<128x128xbf16>, vector<32x128xf32> -> vector<32x128xf32>
    %cst_7 = arith.constant dense<0.000000e+00> : vector<32x128xf32>
    %6 = tpu.matmul %1, %5, %cst_7 {dimension_numbers = #tpu.dot_dimension_numbers<[1], [0], [0], [1], [0, 0, 1, 1], [], []>} : vector<32x32xf32>, vector<32x128xf32>, vector<32x128xf32> -> vector<32x128xf32>
    %c0_8 = arith.constant 0 : index
    %c0_9 = arith.constant 0 : index
    %7 = vector.load %arg4[%c0_8, %c0_9] : memref<1x128xf32, #tpu.memory_space<vmem>>, vector<1x128xf32>
    %8 = vector.broadcast %7 : vector<1x128xf32> to vector<32x128xf32>
    %9 = arith.addf %6, %8 : vector<32x128xf32>
    %cst_10 = arith.constant 0.000000e+00 : f32
    %10 = vector.broadcast %cst_10 : f32 to vector<32x128xf32>
    %11 = arith.maximumf %9, %10 : vector<32x128xf32>
    %12 = arith.truncf %11 : vector<32x128xf32> to vector<32x128xbf16>
    %c0_11 = arith.constant 0 : index
    %c0_12 = arith.constant 0 : index
    %13 = vector.load %arg5[%c0_11, %c0_12] : memref<128x128xbf16, #tpu.memory_space<vmem>>, vector<128x128xbf16>
    %cst_13 = arith.constant dense<0.000000e+00> : vector<32x128xf32>
    %14 = tpu.matmul %12, %13, %cst_13 {dimension_numbers = #tpu.dot_dimension_numbers<[1], [0], [0], [1], [0, 0, 1, 1], [], []>} : vector<32x128xbf16>, vector<128x128xbf16>, vector<32x128xf32> -> vector<32x128xf32>
    %cst_14 = arith.constant dense<0.000000e+00> : vector<32x128xf32>
    %15 = tpu.matmul %1, %14, %cst_14 {dimension_numbers = #tpu.dot_dimension_numbers<[1], [0], [0], [1], [0, 0, 1, 1], [], []>} : vector<32x32xf32>, vector<32x128xf32>, vector<32x128xf32> -> vector<32x128xf32>
    %c0_15 = arith.constant 0 : index
    %c0_16 = arith.constant 0 : index
    %16 = vector.load %arg6[%c0_15, %c0_16] : memref<1x128xf32, #tpu.memory_space<vmem>>, vector<1x128xf32>
    %17 = vector.broadcast %16 : vector<1x128xf32> to vector<32x128xf32>
    %18 = arith.addf %15, %17 : vector<32x128xf32>
    %19 = vector.shape_cast %18 : vector<32x128xf32> to vector<2x16x128xf32>
    %c0_17 = arith.constant 0 : index
    %c0_18 = arith.constant 0 : index
    %c0_19 = arith.constant 0 : index
    %20 = vector.load %arg7[%c0_17, %c0_18, %c0_19] : memref<2x16x128xf32, #tpu.memory_space<vmem>>, vector<2x16x128xf32>
    tpu.vector_store %arg7[%c0_17, %c0_18, %c0_19], %19 {strides = array<i32>} : memref<2x16x128xf32, #tpu.memory_space<vmem>>, vector<2x16x128xf32>,
    return
  }
  func.func @transform_0(%arg0: i32) -> (i32, i32, i32) {
    %c0_i32 = arith.constant 0 : i32
    %c0_i32_0 = arith.constant 0 : i32
    %c0_i32_1 = arith.constant 0 : i32
    return %arg0, %c0_i32, %c0_i32_0 : i32, i32, i32
  }
  func.func @transform_1(%arg0: i32) -> (i32, i32, i32) {
    %c0_i32 = arith.constant 0 : i32
    %c0_i32_0 = arith.constant 0 : i32
    %c0_i32_1 = arith.constant 0 : i32
    return %arg0, %c0_i32, %c0_i32_0 : i32, i32, i32
  }
  func.func @transform_2(%arg0: i32) -> (i32, i32) {
    %c0_i32 = arith.constant 0 : i32
    %c0_i32_0 = arith.constant 0 : i32
    %c0_i32_1 = arith.constant 0 : i32
    return %c0_i32, %c0_i32_0 : i32, i32
  }
  func.func @transform_3(%arg0: i32) -> (i32, i32) {
    %c0_i32 = arith.constant 0 : i32
    %c0_i32_0 = arith.constant 0 : i32
    %c0_i32_1 = arith.constant 0 : i32
    return %c0_i32, %c0_i32_0 : i32, i32
  }
  func.func @transform_4(%arg0: i32) -> (i32, i32) {
    %c0_i32 = arith.constant 0 : i32
    %c0_i32_0 = arith.constant 0 : i32
    %c0_i32_1 = arith.constant 0 : i32
    return %c0_i32, %c0_i32_0 : i32, i32
  }
  func.func @transform_5(%arg0: i32) -> (i32, i32) {
    %c0_i32 = arith.constant 0 : i32
    %c0_i32_0 = arith.constant 0 : i32
    %c0_i32_1 = arith.constant 0 : i32
    return %c0_i32, %c0_i32_0 : i32, i32
  }
  func.func @transform_6(%arg0: i32) -> (i32, i32, i32) {
    %c0_i32 = arith.constant 0 : i32
    %c0_i32_0 = arith.constant 0 : i32
    %c0_i32_1 = arith.constant 0 : i32
    return %arg0, %c0_i32, %c0_i32_0 : i32, i32, i32
  }
}

</mosaic_0001>

<bundles_post_ra>
// kernel: view_encoder_forward.1
= control target key start
LH: loop header
LB: loop body
LE: loop exit
PB: predicated region body
PF: predicated region fallthrough
CT: control target
= control target key end

     0   :  { %11 = vsyncpa [#allocation3], 0  ;;  %s1055_s0 = inlined_call_operand.vmem [shape: f32[2,32,32], index: 0, kind: input, shape index: {}]   ;;  %s1056_s1 = inlined_call_operand.vmem [shape: bf16[4,16,128], index: 1, kind: input, shape index: {}]   ;;  %s1057_s2 = inlined_call_operand.vmem [shape: bf16[128,128], index: 2, kind: input, shape index: {}]   ;;  %s1058_s3 = inlined_call_operand.vmem [shape: f32[1,128], index: 3, kind: input, shape index: {}]   ;;  %s1059_s4 = inlined_call_operand.vmem [shape: bf16[128,128], index: 4, kind: input, shape index: {}]   ;;  %s1060_s5 = inlined_call_operand.vmem [shape: f32[1,128], index: 5, kind: input, shape index: {}]   ;;  %s1061_s6 = inlined_call_operand.hbm [shape: f32[4,16,128], index: 6, kind: output, shape index: {}]  }
   0x1   :  { %13 = vsyncpa [#allocation3 + $0x1], 0  ;;  %s904_s21 = smov 0   ;;  %s906_s22 = smov 0  }
   0x2   :  { %s908_s23 = smov 0   ;;  %s910_s24 = smov 0  }
   0x3 LB: > { %s925_s25 = sadd.s32 4294967295, %s865_s24   ;;  %s642_s26 = sadd.s32 4294967294, %s865_s24   ;;  %s865_s24 = sphi %s910_s24, %s1067_s24   ;;  %s861_s23 = sphi %s908_s23, %s1066_s23   ;;  %s857_s22 = sphi %s906_s22, %s1065_s22   ;;  %s853_s21 = sphi %s904_s21, %s1064_s21  }
   0x4   : > { %s929_s27 = sadd.s32 1, %s865_s24   ;;  %s162_s28 = sadd.s32 1, %s861_s23 }
   0x5   : > { %s159_s29 = ssub.s32 %s865_s24, %s929_s27  ;;  %p172_p0 = scmp.ne.s32.totalorder %s861_s23, %s857_s22 }
   0x6   : > { %p160_p1 = scmp.eq.s32.totalorder %s159_s29, 0  ;;  %p173_p2 = scmp.eq.s32.totalorder %s925_s25, 1 }
   0x7   : > { %p178_p3 = scmp.ne.s32.totalorder %s857_s22, %s853_s21  ;;  %p179_p4 = scmp.eq.s32.totalorder %s642_s26, 1 }
   0x8   : > { %s940_s30 = scalar_select %p160_p1, %s861_s23, %s162_s28  }
   0x9   : > { %p942_p5 = por %p173_p2, %p172_p0  ;;  %p946_p6 = por %p179_p4, %p178_p3 }
   0xa   : > { %p645_p7 = scmp.ge.s32.totalorder %s865_s24, 1  ;;  %p227_p8 = scmp.lt.s32.totalorder %s865_s24, 3 }
   0xc   : > { %p228_p9 = pnand %p645_p7, %p227_p8 }
   0xd   : > { %s649_s17 = sshll.u32 (!%p228_p9), %s925_s25, 1  ;;  %p263_p11 = scmp.lt.s32.totalorder (!%p228_p9), %s925_s25, 1 }
   0xe   : > { %231 = sbr.rel (%p228_p9) target bundleno = 673 (0x2a1), region = 44  ;;  %p269_p10 = scmp.lt.s32.totalorder (!%p228_p9), %s649_s17, 3 }
   0xf   : > { %s260_s29 = sand.u32 (!%p228_p9), 1, %s857_s22   ;;  %s759_s13 = sshll.u32 (!%p228_p9), %s925_s25, 5 }
  0x10   : > { %s552_s19 = scalar_lea.sflag (!%p228_p9), [#allocation3], %s260_s29 }
  0x13   : > { %v749_v0 = vld [vmem:[%s1057_s2 + $0x38] sm:$0xff]  ;;  %v748_v1 = vld [vmem:[%s1057_s2 + $0x30] sm:$0xff]  ;;  %v747_v2 = vld [vmem:[%s1057_s2 + $0x28] sm:$0xff]  ;;  %s1069_s17 = smov (!%p269_p10, %s649_s17), 3  ;;  %vm383_vm0 = vcmask 261120  }
  0x14   : > { %360 = vmatpush.bf16.msra.mxu0 %v749_v0  ;;  %v746_v3 = vld [vmem:[%s1057_s2 + $0x20] sm:$0xff]  ;;  %v745_v4 = vld [vmem:[%s1057_s2 + $0x18] sm:$0xff]  ;;  %v744_v5 = vld [vmem:[%s1057_s2 + $0x10] sm:$0xff]  ;;  %s739_s9 = sshll.u32 %s1069_s17, 3 }
  0x15   : > { %v743_v6 = vld [vmem:[%s1057_s2 + $0x8] sm:$0xff]  ;;  %v742_v7 = vld [vmem:[%s1057_s2] sm:$0xff]  ;;  %s273_s14 = scalar_lea.vmem %s1056_s1, %s739_s9  ;;  %v757_v14 = vld [vmem:[%s1059_s4 + $0x38] sm:$0xff]  ;;  %s646_s9 = sshll.u32 %s260_s29, 5 }
  0x16   : > { %v740_v8 = vld [vmem:[%s273_s14] sm:$0xff]  ;;  %v741_v9 = vld [vmem:[%s273_s14 + $0x8] sm:$0xff]  ;;  %s264_s15 = scalar_select %p263_p11, %s925_s25, 1  ;;  %495 = vmatpush.bf16.msra.mxu2 %v757_v14  ;;  %v756_v15 = vld [vmem:[%s1059_s4 + $0x30] sm:$0xff] }
  0x17   : > { %v755_v17 = vld [vmem:[%s1059_s4 + $0x28] sm:$0xff]  ;;  %v754_v18 = vld [vmem:[%s1059_s4 + $0x20] sm:$0xff]  ;;  %v753_v22 = vld [vmem:[%s1059_s4 + $0x18] sm:$0xff]  ;;  %s262_s12 = scalar_lea.vmem [#allocation2], %s646_s9  ;;  %s823_s9 = scalar_lea.hbm %s1061_s6, 64 }
  0x18   : > { %361 = vmatpush.bf16.msra.mxu0 %v748_v1  ;;  %s738_s16 = sshll.u32 %s264_s15, 5  ;;  %v752_v23 = vld [vmem:[%s1059_s4 + $0x10] sm:$0xff]  ;;  %v751_v24 = vld [vmem:[%s1059_s4 + $0x8] sm:$0xff]  ;;  %v750_v25 = vld [vmem:[%s1059_s4] sm:$0xff]  ;;  %s565_s17 = sshll.u32 %s262_s12, 4  ;;  %s566_s17 = int_to_ptr.vmem [resolvable:$true] %s565_s17 }
  0x19   : > { %s267_s26 = scalar_lea.vmem %s1055_s0, %s738_s16  ;;  %v801_v27 = vld [vmem:[%s1058_s3] ss:$0 sm:$0xff]  ;;  %s564_s16 = scalar_lea.hbm %s1061_s6, %s759_s13 }
  0x1a   : > { %v276_v16 = vld [vmem:[%s267_s26] sm:$0xff]  ;;  %496 = vmatpush.bf16.msra.mxu2 %v756_v15  ;;  %v277_v19 = vld [vmem:[%s267_s26 + $0x8] sm:$0xff]  ;;  %v278_v20 = vld [vmem:[%s267_s26 + $0x10] sm:$0xff]  ;;  %s567_s18 = sshll.u32 %s564_s16, 4  ;;  %s568_s18 = int_to_ptr.hbm [resolvable:$true] %s567_s18 }
  0x1b   : > { %v279_v21 = vld [vmem:[%s267_s26 + $0x18] sm:$0xff]  ;;  %v802_v45 = vld [vmem:[%s1060_s5] ss:$0 sm:$0xff]  ;;  %s817_s20 = sshra.s32 %s568_s18, 4  ;;  %s818_s20 = int_to_ptr.hbm [resolvable:$true] %s817_s20 }
  0x1c   : > { %362 = vmatpush.bf16.msra.mxu0 %v747_v2  ;;  %s819_s26 = scalar_lea.hbm %s818_s20, 32  ;;  %p824_p1 = scmp.lt.s32.totalorder %s818_s20, %s1061_s6 }
  0x1d   : > { %p820_p12 = scmp.ne.s32.totalorder %s818_s20, %s819_s26  ;;  %p825_p2 = scmp.lt.s32.totalorder %s823_s9, %s819_s26 }
  0x1e   : > { %497 = vmatpush.bf16.msra.mxu2 %v755_v17 }
  0x1f   : > { %p821_p13 = pnand %p820_p12, %p942_p5  ;;  %p826_p3 = por %p825_p2, %p824_p1 }
  0x20   : > { %363 = vmatpush.bf16.msra.mxu0 %v746_v3 }
  0x21   : > { %p822_p0 = pneg %p821_p13 }
  0x22   : > { %498 = vmatpush.bf16.msra.mxu2 %v754_v18 }
  0x23   : > { %p827_p4 = pnand %p826_p3, %p822_p0 }
  0x24   : > { %364 = vmatpush.bf16.msra.mxu0 %v745_v4 }
  0x26   : > { %499 = vmatpush.bf16.msra.mxu2 %v753_v22 }
  0x28   : > { %365 = vmatpush.bf16.msra.mxu0 %v744_v5 }
  0x2a   : > { %500 = vmatpush.bf16.msra.mxu2 %v752_v23 }
  0x2c   : > { %366 = vmatpush.bf16.msra.mxu0 %v743_v6 }
  0x2e   : > { %501 = vmatpush.bf16.msra.mxu2 %v751_v24 }
  0x30   : > { %367 = vmatpush.bf16.msra.mxu0 %v742_v7 }
  0x32   : > { %502 = vmatpush.bf16.msra.mxu2 %v750_v25 }
  0x33   : > { %368 = vmatmul.bf16.vlgmr.msra.gmra.mxu0 %v740_v8 }
  0x43   : > { %373 = vmatmul.bf16.gmra.mxu0 %v741_v9 }
  0xb0   : > { %v369_v10 = vpop.f32.mrf.mxu0 }
  0xb8   : > { %v371_v11 = vpop.f32.mrf.mxu0 }
  0xc0   : > { %v374_v12 = vpop.f32.mrf.mxu0 }
  0xc8   : > { %v376_v13 = vpop.f32.mrf.mxu0 }
  0xc9   : > { %408 = vmatpush.msra.mxu1 %v376_v13 }
  0xcb   : > { %409 = vmatpush.msra.mxu1 %v374_v12 }
  0xcd   : > { %410 = vmatpush.msra.mxu1 %v371_v11 }
  0xcf   : > { %411 = vmatpush.msra.mxu1 %v369_v10 }
  0xd0   : > { %692 = vmatmul.msk.f32.vlgmr.msra.gmra.mxu1 %vm383_vm0, %v276_v16 }
  0xd8   : > { %693 = vmatmul.msk.f32.gmra.mxu1 %vm383_vm0, %v277_v19 }
  0xe0   : > { %694 = vmatmul.msk.f32.gmra.mxu1 %vm383_vm0, %v278_v20 }
  0xe8   : > { %695 = vmatmul.msk.f32.gmra.mxu1 %vm383_vm0, %v279_v21 }
 0x14d   : > { %v413_v26 = vpop.f32.mrf.mxu1 }
 0x14e   : > { %v414_v28 = vadd.f32 %v801_v27, %v413_v26 }
 0x150   : > { %v425_v31 = vmax.f32 %v414_v28, 0.0 }
 0x155   : > { %v416_v29 = vpop.f32.mrf.mxu1 }
 0x156   : > { %v417_v30 = vadd.f32 %v801_v27, %v416_v29 }
 0x158   : > { %v426_v32 = vmax.f32 %v417_v30, 0.0 }
 0x15a   : > { %v429_v33 = vpack.c.bf16 %v426_v32, %v425_v31 }
 0x15c   : > { %503 = vmatmul.bf16.vlgmr.msra.gmra.mxu2 %v429_v33 }
 0x15d   : > { %v419_v34 = vpop.f32.mrf.mxu1 }
 0x15e   : > { %v420_v35 = vadd.f32 %v801_v27, %v419_v34 }
 0x160   : > { %v427_v38 = vmax.f32 %v420_v35, 0.0 }
 0x165   : > { %v422_v36 = vpop.f32.mrf.mxu1 }
 0x166   : > { %v423_v37 = vadd.f32 %v801_v27, %v422_v36 }
 0x168   : > { %v428_v39 = vmax.f32 %v423_v37, 0.0 }
 0x16a   : > { %v430_v40 = vpack.c.bf16 %v428_v39, %v427_v38 }
 0x16c   : > { %508 = vmatmul.bf16.gmra.mxu2 %v430_v40 }
 0x1df   : > { %v504_v41 = vpop.f32.mrf.mxu2 }
 0x1e7   : > { %v506_v42 = vpop.f32.mrf.mxu2 }
 0x1ef   : > { %v509_v43 = vpop.f32.mrf.mxu2 }
 0x1f7   : > { %v511_v44 = vpop.f32.mrf.mxu2 }
 0x1f8   : > { %530 = vmatpush.msra.mxu3 %v511_v44 }
 0x1fa   : > { %531 = vmatpush.msra.mxu3 %v509_v43 }
 0x1fc   : > { %532 = vmatpush.msra.mxu3 %v506_v42 }
 0x1fe   : > { %533 = vmatpush.msra.mxu3 %v504_v41 }
 0x1ff   : > { %728 = vmatmul.msk.f32.vlgmr.msra.gmra.mxu3 %vm383_vm0, %v276_v16 }
 0x207   : > { %729 = vmatmul.msk.f32.gmra.mxu3 %vm383_vm0, %v277_v19 }
 0x20f   : > { %730 = vmatmul.msk.f32.gmra.mxu3 %vm383_vm0, %v278_v20 }
 0x217   : > { %731 = vmatmul.msk.f32.gmra.mxu3 %vm383_vm0, %v279_v21 }
 0x282   : > { %v535_v46 = vpop.f32.mrf.mxu3 }
 0x283   : > { %v536_v47 = vadd.f32 %v802_v45, %v535_v46 }
 0x285   : > { %547 = vst [vmem:[%s262_s12] sm:$0xff] %v536_v47 }
 0x28a   : > { %v538_v48 = vpop.f32.mrf.mxu3 }
 0x28b   : > { %v539_v49 = vadd.f32 %v802_v45, %v538_v48 }
 0x28d   : > { %548 = vst [vmem:[%s262_s12 + $0x8] sm:$0xff] %v539_v49 }
 0x292   : > { %v541_v50 = vpop.f32.mrf.mxu3 }
 0x293   : > { %v542_v51 = vadd.f32 %v802_v45, %v541_v50 }
 0x295   : > { %549 = vst [vmem:[%s262_s12 + $0x10] sm:$0xff] %v542_v51 }
 0x29a   : > { %v544_v52 = vpop.f32.mrf.mxu3 }
 0x29b   : > { %v545_v53 = vadd.f32 %v802_v45, %v544_v52 }
 0x29d   : > { %550 = vst [vmem:[%s262_s12 + $0x18] sm:$0xff] %v545_v53 }
 0x29e   : > { %830 = shalt.err (!%p827_p4)
}
 0x29f   : > { %s867_s29 = smov 128   ;;  %s868_s12 = smov 8  }
 0x2a0   : > { %760 = dma.vmem_to_hbm [thread:$0]  (%p942_p5), %s566_s17, 512, %s568_s18, %s552_s19, %s867_s29, %s867_s29, %s868_s12  }
 0x2a1 PF: > { %p766_p7 = scmp.ge.s32.totalorder %s865_s24, 2  ;;  %s582_s13 = sand.u32 1, %s853_s21  }
 0x2a2   : > { %s583_s14 = scalar_lea.sflag [#allocation3], %s582_s13 }
 0x2a3   : > { %p763_p8 = pnand %p766_p7, %p946_p6 }
 0x2a5   : > { %p764_p9 = pneg %p763_p8 }
 0x2a7   : > { %848 = dma.done.wait (%p764_p9), %s583_s14, 512  }
 0x2a8   : > { %850 = vsyncadd (%p764_p9), %s583_s14, 4294966784  ;;  %p16_p10 = scmp.ge.s32.totalorder %s929_s27, 4   ;;  %s1064_s21 = smov %s857_s22 }
 0x2a9   : > { %s1065_s22 = smov %s861_s23  ;;  %s1066_s23 = smov %s940_s30 }
 0x2aa   : > { %s1067_s24 = smov %s929_s27  ;;  %18 = sbr.rel (!%p16_p10) target bundleno = 3 (0x3), region = 82 }
 0x2af   :  { %589 = vsyncpa [#allocation3], 1 }
 0x2b0   :  { %591 = vsyncpa [#allocation3 + $0x1], 1 }

</bundles_post_ra>
